<compile_context>
chip_gen: v6e
topology: v6e:2x2x1
jax: 0.10.0
libtpu: 0.0.40
codegen_flags: <defaults>
</compile_context>

<pallas_src>
import jax
import jax.numpy as jnp
from jax.experimental import pallas as pl
from jax.experimental.pallas import tpu as pltpu

EPS = 1e-5
EXPANSION = 4  # Bottleneck expansion (feat_dim = 512 * 4 = 2048)
VMEM_LIMIT = 48 * 1024 * 1024  # safe on v7x (64 MiB physical), fine on v5e/v6e


# --------------------------------------------------------------------------
# Tiling helpers
# --------------------------------------------------------------------------
def _round_up(x, m):
    return ((x + m - 1) // m) * m


def _tile_rows(M, target=256, align=16):
    """Row-tile size and padded row count.  tm is a multiple of `align`."""
    if M < target:
        tm = _round_up(M, align)
        return tm, tm
    if M % target == 0:
        return target, M
    for cand in range(target, align - 1, -align):
        if M % cand == 0:
            return cand, M
    return target, _round_up(M, target)


def _tile_k(K, target=512):
    """K-tile: multiple of 128 dividing K, else the full K (block == full dim)."""
    if K <= target:
        return K
    for cand in (512, 384, 256, 128):
        if K % cand == 0:
            return cand
    return K


def _tile_n(Cout, target=512):
    if Cout <= target:
        return Cout
    for cand in (512, 256, 128):
        if Cout % cand == 0:
            return cand
    return Cout


# --------------------------------------------------------------------------
# Pallas kernels
# --------------------------------------------------------------------------
def _make_matmul_bn_kernel(apply_relu, has_residual):
    """acc += A_bf16 @ W_bf16 (f32); at last K-step: +bias [+res], [relu], store."""
    def kernel(*refs):
        if has_residual:
            a_ref, w_ref, b_ref, r_ref, o_ref, acc_ref = refs
        else:
            a_ref, w_ref, b_ref, o_ref, acc_ref = refs

        @pl.when(pl.program_id(2) == 0)
        def _():
            acc_ref[...] = jnp.zeros_like(acc_ref)

        acc_ref[...] += jnp.dot(a_ref[...], w_ref[...],
                                preferred_element_type=jnp.float32)

        @pl.when(pl.program_id(2) == pl.num_programs(2) - 1)
        def _():
            out = acc_ref[...] + b_ref[...]
            if has_residual:
                out = out + r_ref[...].astype(jnp.float32)
            if apply_relu:
                out = jnp.maximum(out, 0.0)
            o_ref[...] = out.astype(o_ref.dtype)

    return kernel


def matmul_bn(a, w, bias, *, relu, residual=None):
    """a: (M,K) bf16, w: (K,Cout) bf16 (BN scale folded in), bias: (Cout,) f32,
    residual: (M,Cout) bf16 or None.  Returns (M,Cout) bf16."""
    M, K = a.shape
    _, Cout = w.shape
    tm, Mpad = _tile_rows(M)
    tk = _tile_k(K)
    tn = _tile_n(Cout)
    nm, nn, nk = Mpad // tm, Cout // tn, K // tk

    a = a.astype(jnp.bfloat16)
    if Mpad != M:
        a = jnp.pad(a, ((0, Mpad - M), (0, 0)))

    args = [a, w.astype(jnp.bfloat16), bias.astype(jnp.float32).reshape(1, Cout)]
    in_specs = [
        pl.BlockSpec((tm, tk), lambda m, n, k: (m, k)),
        pl.BlockSpec((tk, tn), lambda m, n, k: (k, n)),
        pl.BlockSpec((1, tn), lambda m, n, k: (0, n)),
    ]
    if residual is not None:
        r = residual.astype(jnp.bfloat16)
        if Mpad != M:
            r = jnp.pad(r, ((0, Mpad - M), (0, 0)))
        args.append(r)
        in_specs.append(pl.BlockSpec((tm, tn), lambda m, n, k: (m, n)))

    out = pl.pallas_call(
        _make_matmul_bn_kernel(relu, residual is not None),
        out_shape=jax.ShapeDtypeStruct((Mpad, Cout), jnp.bfloat16),
        grid=(nm, nn, nk),
        in_specs=in_specs,
        out_specs=pl.BlockSpec((tm, tn), lambda m, n, k: (m, n)),
        scratch_shapes=[pltpu.VMEM((tm, tn), jnp.float32)],
        compiler_params=pltpu.CompilerParams(
            dimension_semantics=("parallel", "parallel", "arbitrary"),
            vmem_limit_bytes=VMEM_LIMIT,
        ),
    )(*args)
    return out[:M] if Mpad != M else out


def _maxpool_kernel(x_ref, o_ref):
    # x_ref: (9, tr, lanes) -> elementwise max over the 9 shifted windows
    o_ref[...] = jnp.max(x_ref[...], axis=0)


def maxpool2d_3x3_s2_p1(x):
    """MaxPool2d(kernel_size=3, stride=2, padding=1) on an NHWC (bf16) tensor."""
    N, H, W, C = x.shape
    xp = jnp.pad(x, ((0, 0), (1, 1), (1, 1), (0, 0)), constant_values=-jnp.inf)
    Ho = (H + 2 - 3) // 2 + 1
    Wo = (W + 2 - 3) // 2 + 1
    wins = []
    for i in range(3):
        for j in range(3):
            sl = xp[:, i:i + 2 * (Ho - 1) + 1:2, j:j + 2 * (Wo - 1) + 1:2, :]
            wins.append(sl.reshape(-1))
    stacked = jnp.stack(wins, axis=0)            # (9, N*Ho*Wo*C)
    total = N * Ho * Wo * C
    # Lane-dense layout for the elementwise reduction: rows of 128 lanes.
    lanes = 128 if total % 128 == 0 else C
    R = total // lanes
    stacked = stacked.reshape(9, R, lanes)

    tr, Rpad = _tile_rows(R, target=256, align=16)
    if Rpad != R:
        stacked = jnp.pad(stacked, ((0, 0), (0, Rpad - R), (0, 0)),
                          constant_values=-jnp.inf)

    out = pl.pallas_call(
        _maxpool_kernel,
        out_shape=jax.ShapeDtypeStruct((Rpad, lanes), x.dtype),
        grid=(Rpad // tr,),
        in_specs=[pl.BlockSpec((9, tr, lanes), lambda i: (0, i, 0))],
        out_specs=pl.BlockSpec((tr, lanes), lambda i: (i, 0)),
        compiler_params=pltpu.CompilerParams(
            dimension_semantics=("parallel",),
            vmem_limit_bytes=VMEM_LIMIT,
        ),
    )(stacked)
    out = out[:R] if Rpad != R else out
    return out.reshape(N, Ho, Wo, C)


# --------------------------------------------------------------------------
# JAX glue: im2col + conv/bn wrapper
# --------------------------------------------------------------------------
def im2col(x, kh, kw, stride, padding, dilation):
    N, H, W, C = x.shape
    xp = jnp.pad(x, ((0, 0), (padding, padding), (padding, padding), (0, 0)))
    Hp, Wp = H + 2 * padding, W + 2 * padding
    eff_kh = dilation * (kh - 1) + 1
    eff_kw = dilation * (kw - 1) + 1
    Ho = (Hp - eff_kh) // stride + 1
    Wo = (Wp - eff_kw) // stride + 1
    cols = []
    for i in range(kh):
        for j in range(kw):
            hs, ws = i * dilation, j * dilation
            sl = xp[:, hs:hs + stride * (Ho - 1) + 1:stride,
                    ws:ws + stride * (Wo - 1) + 1:stride, :]
            cols.append(sl)
    # feature order: (kh, kw, Cin), Cin fastest
    return jnp.concatenate(cols, axis=-1), Ho, Wo


def conv_bn(x, w, bn, *, stride=1, padding=0, dilation=1, relu=True, residual=None):
    """x: NHWC bf16, w: PyTorch OIHW f32, bn: eval-mode BatchNorm params."""
    N, H, W_, Cin = x.shape
    Cout, _, kh, kw = w.shape
    patches, Ho, Wo = im2col(x, kh, kw, stride, padding, dilation)
    A = patches.reshape(N * Ho * Wo, kh * kw * Cin)
    # Fold BN (eval) scale into the weight columns; keep only a bias vector.
    scale = bn["gamma"] / jnp.sqrt(bn["var"] + EPS)
    bias = bn["beta"] - bn["mean"] * scale
    Wm = jnp.transpose(w, (2, 3, 1, 0)).reshape(kh * kw * Cin, Cout)
    Wm = (Wm * scale[None, :]).astype(jnp.bfloat16)
    res2d = None if residual is None else residual.reshape(N * Ho * Wo, Cout)
    out = matmul_bn(A, Wm, bias, relu=relu, residual=res2d)
    return out.reshape(N, Ho, Wo, Cout)


# --------------------------------------------------------------------------
# Parameter construction (deterministic, matches module __init__)
# --------------------------------------------------------------------------
def kaiming_oihw(key, cout, cin, kh, kw):
    fan_out = cout * kh * kw
    std = (2.0 / fan_out) ** 0.5
    return jax.random.normal(key, (cout, cin, kh, kw), jnp.float32) * std


def bn_params(c):
    return dict(gamma=jnp.ones((c,), jnp.float32),
                beta=jnp.zeros((c,), jnp.float32),
                mean=jnp.zeros((c,), jnp.float32),
                var=jnp.ones((c,), jnp.float32))


def init_bottleneck(key, inplanes, planes, stride, dilation, downsample):
    k = jax.random.split(key, 4)
    p = dict(
        conv1=kaiming_oihw(k[0], planes, inplanes, 1, 1), bn1=bn_params(planes),
        conv2=kaiming_oihw(k[1], planes, planes, 3, 3), bn2=bn_params(planes),
        conv3=kaiming_oihw(k[2], planes * EXPANSION, planes, 1, 1),
        bn3=bn_params(planes * EXPANSION),
        stride=stride, dilation=dilation,
    )
    if downsample:
        p["down_conv"] = kaiming_oihw(k[3], planes * EXPANSION, inplanes, 1, 1)
        p["down_bn"] = bn_params(planes * EXPANSION)
    return p


def init_resnet(key, layers, strides, dilations):
    keys = jax.random.split(key, 5)
    params = dict(conv1=kaiming_oihw(keys[0], 64, 3, 7, 7), bn1=bn_params(64))
    inplanes = 64
    planes_list = [64, 128, 256, 512]
    for li in range(4):
        planes, stride, dilation = planes_list[li], strides[li], dilations[li]
        bkeys = jax.random.split(keys[li + 1], layers[li])
        blocks = []
        for bi in range(layers[li]):
            if bi == 0:
                down = (stride != 1) or (inplanes != planes * EXPANSION)
                blocks.append(init_bottleneck(bkeys[bi], inplanes, planes,
                                              stride, dilation, down))
                inplanes = planes * EXPANSION
            else:
                blocks.append(init_bottleneck(bkeys[bi], inplanes, planes, 1, 1, False))
        params[f"layer{li + 1}"] = blocks
    return params


# --------------------------------------------------------------------------
# Forward (frozen DilatedResNet forward, eval mode)
# --------------------------------------------------------------------------
def bottleneck_forward(p, x):
    out = conv_bn(x, p["conv1"], p["bn1"], relu=True)
    out = conv_bn(out, p["conv2"], p["bn2"], stride=p["stride"],
                  padding=p["dilation"], dilation=p["dilation"], relu=True)
    if "down_conv" in p:
        identity = conv_bn(x, p["down_conv"], p["down_bn"],
                           stride=p["stride"], relu=False)
    else:
        identity = x
    # conv3 + bn3, add identity, then relu (fused in the kernel epilogue)
    out = conv_bn(out, p["conv3"], p["bn3"], relu=True, residual=identity)
    return out


def resnet_forward(params, x_nchw):
    x = jnp.transpose(x_nchw, (0, 2, 3, 1)).astype(jnp.bfloat16)  # NCHW -> NHWC
    x = conv_bn(x, params["conv1"], params["bn1"], stride=2, padding=3, relu=True)
    x = maxpool2d_3x3_s2_p1(x)
    for li in range(4):
        for blk in params[f"layer{li + 1}"]:
            x = bottleneck_forward(blk, x)
    return jnp.transpose(x, (0, 3, 1, 2)).astype(jnp.float32)     # NHWC -> NCHW


if __name__ == "__main__":
    key = jax.random.PRNGKey(0)
    pkey, xkey = jax.random.split(key)

    layers = [1, 1, 1, 1]          # small synthetic Bottleneck depth
    strides = [1, 2, 2, 2]
    dilations = [1, 1, 1, 1]
    params = init_resnet(pkey, layers, strides, dilations)

    # small RGB batch: (N=2, C=3, H=64, W=64)
    x = jax.random.normal(xkey, (2, 3, 64, 64), jnp.float32)

    out = resnet_forward(params, x)
    out = jax.block_until_ready(out)

    assert out.shape == (2, 512 * EXPANSION, 2, 2), out.shape
    assert bool(jnp.isfinite(out).all())
    print("KERNEL_OK")
</pallas_src>

<mosaic_0001>
module attributes {stable_mosaic.version = 11 : i64} {
  func.func @kernel(%arg0: i32, %arg1: i32, %arg2: i32, %arg3: memref<256x147xbf16, #tpu.memory_space<vmem>>, %arg4: memref<147x64xbf16, #tpu.memory_space<vmem>>, %arg5: memref<1x64xf32, #tpu.memory_space<vmem>>, %arg6: memref<256x64xbf16, #tpu.memory_space<vmem>>, %arg7: memref<256x64xf32, #tpu.memory_space<vmem>>) attributes {dimension_semantics = [#tpu.dimension_semantics<parallel>, #tpu.dimension_semantics<parallel>, #tpu.dimension_semantics<arbitrary>], iteration_bounds = array<i64: 8, 1, 1>, scalar_prefetch = 0 : i64, scratch_operands = 1 : i64, tpu.core_type = #tpu.core_type<tc>, window_params = [{transform_indices = @transform_0, window_bounds = array<i64: 256, 147>}, {transform_indices = @transform_1, window_bounds = array<i64: 147, 64>}, {transform_indices = @transform_2, window_bounds = array<i64: 1, 64>}, {transform_indices = @transform_3, window_bounds = array<i64: 256, 64>}]} {
    %c0_i32 = arith.constant 0 : i32
    %0 = arith.cmpi eq, %arg2, %c0_i32 : i32
    %1 = arith.extui %0 : i1 to i32
    %c0_i32_0 = arith.constant 0 : i32
    %2 = arith.cmpi ne, %1, %c0_i32_0 : i32
    scf.if %2 {
      %cst_10 = arith.constant 0.000000e+00 : f32
      %12 = vector.broadcast %cst_10 : f32 to vector<256x64xf32>
      %c0_11 = arith.constant 0 : index
      %c0_12 = arith.constant 0 : index
      %13 = vector.load %arg7[%c0_11, %c0_12] : memref<256x64xf32, #tpu.memory_space<vmem>>, vector<256x64xf32>
      tpu.vector_store %arg7[%c0_11, %c0_12], %12 {strides = array<i32>} : memref<256x64xf32, #tpu.memory_space<vmem>>, vector<256x64xf32>,
    } else {
    }
    %c0 = arith.constant 0 : index
    %c0_1 = arith.constant 0 : index
    %3 = vector.load %arg7[%c0, %c0_1] : memref<256x64xf32, #tpu.memory_space<vmem>>, vector<256x64xf32>
    %c0_2 = arith.constant 0 : index
    %c0_3 = arith.constant 0 : index
    %4 = vector.load %arg3[%c0_2, %c0_3] : memref<256x147xbf16, #tpu.memory_space<vmem>>, vector<256x147xbf16>
    %c0_4 = arith.constant 0 : index
    %c0_5 = arith.constant 0 : index
    %5 = vector.load %arg4[%c0_4, %c0_5] : memref<147x64xbf16, #tpu.memory_space<vmem>>, vector<147x64xbf16>
    %cst = arith.constant dense<0.000000e+00> : vector<256x64xf32>
    %6 = tpu.matmul %4, %5, %cst {dimension_numbers = #tpu.dot_dimension_numbers<[1], [0], [0], [1], [0, 0, 1, 1], [], []>} : vector<256x147xbf16>, vector<147x64xbf16>, vector<256x64xf32> -> vector<256x64xf32>
    %7 = arith.addf %3, %6 : vector<256x64xf32>
    %c0_6 = arith.constant 0 : index
    %c0_7 = arith.constant 0 : index
    %8 = vector.load %arg7[%c0_6, %c0_7] : memref<256x64xf32, #tpu.memory_space<vmem>>, vector<256x64xf32>
    tpu.vector_store %arg7[%c0_6, %c0_7], %7 {strides = array<i32>} : memref<256x64xf32, #tpu.memory_space<vmem>>, vector<256x64xf32>,
    %c0_i32_8 = arith.constant 0 : i32
    %9 = arith.cmpi eq, %arg2, %c0_i32_8 : i32
    %10 = arith.extui %9 : i1 to i32
    %c0_i32_9 = arith.constant 0 : i32
    %11 = arith.cmpi ne, %10, %c0_i32_9 : i32
    scf.if %11 {
      %c0_10 = arith.constant 0 : index
      %c0_11 = arith.constant 0 : index
      %12 = vector.load %arg7[%c0_10, %c0_11] : memref<256x64xf32, #tpu.memory_space<vmem>>, vector<256x64xf32>
      %c0_12 = arith.constant 0 : index
      %c0_13 = arith.constant 0 : index
      %13 = vector.load %arg5[%c0_12, %c0_13] : memref<1x64xf32, #tpu.memory_space<vmem>>, vector<1x64xf32>
      %14 = vector.broadcast %13 : vector<1x64xf32> to vector<256x64xf32>
      %15 = arith.addf %12, %14 : vector<256x64xf32>
      %cst_14 = arith.constant 0.000000e+00 : f32
      %16 = vector.broadcast %cst_14 : f32 to vector<256x64xf32>
      %17 = arith.maximumf %15, %16 : vector<256x64xf32>
      %18 = arith.truncf %17 : vector<256x64xf32> to vector<256x64xbf16>
      %c0_15 = arith.constant 0 : index
      %c0_16 = arith.constant 0 : index
      %19 = vector.load %arg6[%c0_15, %c0_16] : memref<256x64xbf16, #tpu.memory_space<vmem>>, vector<256x64xbf16>
      tpu.vector_store %arg6[%c0_15, %c0_16], %18 {strides = array<i32>} : memref<256x64xbf16, #tpu.memory_space<vmem>>, vector<256x64xbf16>,
    } else {
    }
    return
  }
  func.func @transform_0(%arg0: i32, %arg1: i32, %arg2: i32) -> (i32, i32) {
    %c0_i32 = arith.constant 0 : i32
    return %arg0, %arg2 : i32, i32
  }
  func.func @transform_1(%arg0: i32, %arg1: i32, %arg2: i32) -> (i32, i32) {
    %c0_i32 = arith.constant 0 : i32
    return %arg2, %arg1 : i32, i32
  }
  func.func @transform_2(%arg0: i32, %arg1: i32, %arg2: i32) -> (i32, i32) {
    %c0_i32 = arith.constant 0 : i32
    %c0_i32_0 = arith.constant 0 : i32
    return %c0_i32, %arg1 : i32, i32
  }
  func.func @transform_3(%arg0: i32, %arg1: i32, %arg2: i32) -> (i32, i32) {
    %c0_i32 = arith.constant 0 : i32
    return %arg0, %arg1 : i32, i32
  }
}

</mosaic_0001>

<bundles_post_ra>
// kernel: tpu_custom_call.1
= control target key start
LH: loop header
LB: loop body
LE: loop exit
PB: predicated region body
PF: predicated region fallthrough
CT: control target
= control target key end

     0   :  { %s1542_s12 = smov 0   ;;  %s1544_s13 = smov 0   ;;  %s1848_s0 = inlined_call_operand.vmem [shape: bf16[2048,147], index: 0, kind: input, shape index: {}]   ;;  %s1849_s1 = inlined_call_operand.vmem [shape: bf16[147,64], index: 1, kind: input, shape index: {}]   ;;  %s1850_s2 = inlined_call_operand.vmem [shape: f32[1,64], index: 2, kind: input, shape index: {}]   ;;  %s1851_s3 = inlined_call_operand.vmem [shape: bf16[2048,64], index: 3, kind: output, shape index: {}]  }
   0x1   :  { %s1546_s14 = smov 0  }
   0x2 LB: > { %s32_s15 = sadd.s32 1, %s1513_s13  ;;  %p1258_p0 = scmp.ge.s32.totalorder %s1517_s14, 1  ;;  %s1517_s14 = sphi %s1546_s14, %s13_s14   ;;  %s1513_s13 = sphi %s1544_s13, %s1853_s13   ;;  %s1509_s12 = sphi %s1542_s12, %s1852_s12  }
   0x3   : > { %p34_p1 = scmp.ge.s32.totalorder %s32_s15, 8  ;;  %p191_p2 = scmp.lt.s32.totalorder %s1517_s14, 9 }
   0x5   : > { %s1855_s15 = smov (%p34_p1, %s32_s15), 0  ;;  %p192_p3 = pnand %p1258_p0, %p191_p2 }
   0x6   : > { %s1259_s22 = sshll.u32 (!%p192_p3), %s1509_s12, 5 }
   0x7   : > { %195 = sbr.rel (%p192_p3) target bundleno = 324 (0x144), region = 32  ;;  %p236_p4 = scmp.lt.s32.totalorder (!%p192_p3), %s1259_s22, 255 }
   0xc   : > { %v1437_v0 = vld [vmem:[%s1849_s1 + $0x38] sm:$0xff]   ;;  %v1519_v1 = vmov 0   ;;  %v1438_v2 = vld [vmem:[%s1849_s1 + $0x30] sm:$0xff]   ;;  %v1439_v3 = vld [vmem:[%s1849_s1 + $0x28] sm:$0xff]   ;;  %s1857_s22 = smov (!%p236_p4, %s1259_s22), 255  ;;  %vm272_vm0 = vcmask 523264  }
   0xd   : > { %645 = vmatprep.subr.bf16.mxu0 %v1519_v1  ;;  %1390 = vmatprep.subr.bf16.mxu1 %v1519_v1  ;;  %v1440_v4 = vld [vmem:[%s1849_s1 + $0x20] sm:$0xff]   ;;  %s1357_s25 = sshll.u32 %s1857_s22, 3  ;;  %v1520_v5 = vmov 0.0   ;;  %v1441_v6 = vld [vmem:[%s1849_s1 + $0x18] sm:$0xff]   ;;  %vm589_vm1 = vcmask 154624   ;;  %v1442_v9 = vld [vmem:[%s1849_s1 + $0x10] sm:$0xff]  }
   0xe   : > { %646 = vmatpush1.bf16.msra.mxu0 %v1437_v0  ;;  %1400 = vmatpush1.bf16.msra.mxu1 %v1437_v0  ;;  %273 = vst.msk [vmem:[#allocation2] sm:$0xff] %vm272_vm0, %v1520_v5  ;;  %274 = vst.msk [vmem:[#allocation2 + $0x8] sm:$0xff] %vm272_vm0, %v1520_v5  ;;  %s1620_s28 = scalar_lea.vmem %s1848_s0, %s1357_s25  ;;  %vm638_vm2 = vcmask 1040384   ;;  %v1443_v10 = vld [vmem:[%s1849_s1 + $0x8] sm:$0xff]   ;;  %vm639_vm3 = vcmask 1041408   ;;  %v1521_v11 = vmov 65535  }
   0xf   : > { %647 = vmatprep.subr.bf16.mxu0 %v1519_v1  ;;  %1391 = vmatprep.subr.bf16.mxu1 %v1519_v1  ;;  %275 = vst.msk [vmem:[#allocation2 + $0x10] sm:$0xff] %vm272_vm0, %v1520_v5  ;;  %276 = vst.msk [vmem:[#allocation2 + $0x18] sm:$0xff] %vm272_vm0, %v1520_v5  ;;  %v1449_v7 = vld [vmem:[%s1620_s28 + $0x4] ss:$8 sps:$4 sm:$0xff]   ;;  %v640_v12 = vsel %vm638_vm2, 4294967295, %v1521_v11  ;;  %s1263_s19 = sshll.u32 %s1857_s22, 2 }
  0x10   : > { %277 = vst.msk [vmem:[#allocation2 + $0x20] sm:$0xff] %vm272_vm0, %v1520_v5  ;;  %278 = vst.msk [vmem:[#allocation2 + $0x28] sm:$0xff] %vm272_vm0, %v1520_v5  ;;  %v1452_v8 = vld [vmem:[%s1620_s28 + $0x84] ss:$8 sps:$4 sm:$0xff]   ;;  %1306 = vmatprep.mubr.msk.bf16.mxu0 %vm589_vm1, %v1449_v7  ;;  %v641_v15 = vsel %vm639_vm3, %v640_v12, 0  ;;  %s1717_s23 = scalar_lea.vmem %s1851_s3, %s1263_s19  ;;  %vm1105_vm4 = vcmask 519168  }
  0x11   : > { %279 = vst.msk [vmem:[#allocation2 + $0x30] sm:$0xff] %vm272_vm0, %v1520_v5  ;;  %280 = vst.msk [vmem:[#allocation2 + $0x38] sm:$0xff] %vm272_vm0, %v1520_v5  ;;  %1314 = vmatprep.mubr.msk.bf16.mxu1 %vm589_vm1, %v1452_v8  ;;  %v1444_v13 = vld [vmem:[%s1849_s1] sm:$0xff]   ;;  %v1445_v14 = vld [vmem:[%s1849_s1 + $0x48] ss:$0 sps:$4 sm:$0x33]  }
  0x12   : > { %648 = vmatpush1.bf16.msra.mxu0 %v1438_v2  ;;  %1401 = vmatpush1.bf16.msra.mxu1 %v1438_v2  ;;  %281 = vst.msk [vmem:[#allocation2 + $0x40] sm:$0xff] %vm272_vm0, %v1520_v5  ;;  %282 = vst.msk [vmem:[#allocation2 + $0x48] sm:$0xff] %vm272_vm0, %v1520_v5  ;;  %v643_v16 = vand.u32 %v1445_v14, %v641_v15  ;;  %v1446_v17 = vld [vmem:[%s1849_s1 + $0x40] sm:$0xff]   ;;  %v1453_v20 = vld [vmem:[%s1620_s28 + $0x14] ss:$8 sps:$4 sm:$0xff]  }
  0x13   : > { %649 = vmatprep.subr.bf16.mxu0 %v1519_v1  ;;  %1392 = vmatprep.subr.bf16.mxu1 %v1519_v1  ;;  %283 = vst.msk [vmem:[#allocation2 + $0x50] sm:$0xff] %vm272_vm0, %v1520_v5  ;;  %284 = vst.msk [vmem:[#allocation2 + $0x58] sm:$0xff] %vm272_vm0, %v1520_v5  ;;  %v1447_v18 = vld [vmem:[%s1620_s28] ss:$8 sps:$4 sm:$0xff]   ;;  %v1455_v21 = vld [vmem:[%s1620_s28 + $0x94] ss:$8 sps:$4 sm:$0xff]  }
  0x14   : > { %285 = vst.msk [vmem:[#allocation2 + $0x60] sm:$0xff] %vm272_vm0, %v1520_v5  ;;  %286 = vst.msk [vmem:[#allocation2 + $0x68] sm:$0xff] %vm272_vm0, %v1520_v5  ;;  %v1450_v19 = vld [vmem:[%s1620_s28 + $0x80] ss:$8 sps:$4 sm:$0xff]   ;;  %v1457_v22 = vld [vmem:[%s1620_s28 + $0x10] ss:$8 sps:$4 sm:$0xff]  }
  0x15   : > { %287 = vst.msk [vmem:[#allocation2 + $0x70] sm:$0xff] %vm272_vm0, %v1520_v5  ;;  %288 = vst.msk [vmem:[#allocation2 + $0x78] sm:$0xff] %vm272_vm0, %v1520_v5  ;;  %v1458_v23 = vld [vmem:[%s1620_s28 + $0x90] ss:$8 sps:$4 sm:$0xff]   ;;  %v1459_v24 = vld [vmem:[%s1620_s28 + $0x24] ss:$8 sps:$4 sm:$0xff]  }
  0x16   : > { %650 = vmatpush1.bf16.msra.mxu0 %v1439_v3  ;;  %1402 = vmatpush1.bf16.msra.mxu1 %v1439_v3  ;;  %289 = vst.msk [vmem:[#allocation2 + $0x80] sm:$0xff] %vm272_vm0, %v1520_v5  ;;  %290 = vst.msk [vmem:[#allocation2 + $0x88] sm:$0xff] %vm272_vm0, %v1520_v5  ;;  %v1461_v25 = vld [vmem:[%s1620_s28 + $0xa4] ss:$8 sps:$4 sm:$0xff]   ;;  %v1463_v26 = vld [vmem:[%s1620_s28 + $0x20] ss:$8 sps:$4 sm:$0xff]  }
  0x17   : > { %651 = vmatprep.subr.bf16.mxu0 %v1519_v1  ;;  %1393 = vmatprep.subr.bf16.mxu1 %v1519_v1  ;;  %291 = vst.msk [vmem:[#allocation2 + $0x90] sm:$0xff] %vm272_vm0, %v1520_v5  ;;  %292 = vst.msk [vmem:[#allocation2 + $0x98] sm:$0xff] %vm272_vm0, %v1520_v5  ;;  %v1464_v27 = vld [vmem:[%s1620_s28 + $0xa0] ss:$8 sps:$4 sm:$0xff]   ;;  %v1465_v28 = vld [vmem:[%s1620_s28 + $0x34] ss:$8 sps:$4 sm:$0xff]  }
  0x18   : > { %293 = vst.msk [vmem:[#allocation2 + $0xa0] sm:$0xff] %vm272_vm0, %v1520_v5  ;;  %294 = vst.msk [vmem:[#allocation2 + $0xa8] sm:$0xff] %vm272_vm0, %v1520_v5  ;;  %v1467_v29 = vld [vmem:[%s1620_s28 + $0xb4] ss:$8 sps:$4 sm:$0xff]   ;;  %v1469_v30 = vld [vmem:[%s1620_s28 + $0x30] ss:$8 sps:$4 sm:$0xff]  }
  0x19   : > { %295 = vst.msk [vmem:[#allocation2 + $0xb0] sm:$0xff] %vm272_vm0, %v1520_v5  ;;  %296 = vst.msk [vmem:[#allocation2 + $0xb8] sm:$0xff] %vm272_vm0, %v1520_v5  ;;  %v1470_v31 = vld [vmem:[%s1620_s28 + $0xb0] ss:$8 sps:$4 sm:$0xff]   ;;  %v1471_v32 = vld [vmem:[%s1620_s28 + $0x44] ss:$8 sps:$4 sm:$0xff]  }
  0x1a   : > { %297 = vst.msk [vmem:[#allocation2 + $0xc0] sm:$0xff] %vm272_vm0, %v1520_v5  ;;  %298 = vst.msk [vmem:[#allocation2 + $0xc8] sm:$0xff] %vm272_vm0, %v1520_v5  ;;  %652 = vmatpush1.bf16.msra.mxu0 %v1440_v4  ;;  %1403 = vmatpush1.bf16.msra.mxu1 %v1440_v4  ;;  %v1473_v33 = vld [vmem:[%s1620_s28 + $0xc4] ss:$8 sps:$4 sm:$0xff]   ;;  %v1475_v34 = vld [vmem:[%s1620_s28 + $0x40] ss:$8 sps:$4 sm:$0xff]  }
  0x1b   : > { %299 = vst.msk [vmem:[#allocation2 + $0xd0] sm:$0xff] %vm272_vm0, %v1520_v5  ;;  %300 = vst.msk [vmem:[#allocation2 + $0xd8] sm:$0xff] %vm272_vm0, %v1520_v5  ;;  %653 = vmatprep.subr.bf16.mxu0 %v1519_v1  ;;  %1394 = vmatprep.subr.bf16.mxu1 %v1519_v1  ;;  %v1476_v35 = vld [vmem:[%s1620_s28 + $0xc0] ss:$8 sps:$4 sm:$0xff]   ;;  %v1477_v36 = vld [vmem:[%s1620_s28 + $0x54] ss:$8 sps:$4 sm:$0xff]  }
  0x1c   : > { %301 = vst.msk [vmem:[#allocation2 + $0xe0] sm:$0xff] %vm272_vm0, %v1520_v5  ;;  %302 = vst.msk [vmem:[#allocation2 + $0xe8] sm:$0xff] %vm272_vm0, %v1520_v5  ;;  %v1479_v37 = vld [vmem:[%s1620_s28 + $0xd4] ss:$8 sps:$4 sm:$0xff]   ;;  %v1481_v38 = vld [vmem:[%s1620_s28 + $0x50] ss:$8 sps:$4 sm:$0xff]  }
  0x1d   : > { %303 = vst.msk [vmem:[#allocation2 + $0xf0] sm:$0xff] %vm272_vm0, %v1520_v5  ;;  %304 = vst.msk [vmem:[#allocation2 + $0xf8] sm:$0xff] %vm272_vm0, %v1520_v5  ;;  %v1482_v39 = vld [vmem:[%s1620_s28 + $0xd0] ss:$8 sps:$4 sm:$0xff]   ;;  %v1483_v40 = vld [vmem:[%s1620_s28 + $0x64] ss:$8 sps:$4 sm:$0xff]  }
  0x1e   : > { %654 = vmatpush1.bf16.msra.mxu0 %v1441_v6  ;;  %1404 = vmatpush1.bf16.msra.mxu1 %v1441_v6  ;;  %v1485_v41 = vld [vmem:[%s1620_s28 + $0xe4] ss:$8 sps:$4 sm:$0xff]   ;;  %v1487_v42 = vld [vmem:[%s1620_s28 + $0x60] ss:$8 sps:$4 sm:$0xff]   ;;  %v1489_v44 = vld [vmem:[%s1620_s28 + $0x74] ss:$8 sps:$4 sm:$0xff]  }
  0x1f   : > { %655 = vmatprep.subr.bf16.mxu0 %v1519_v1  ;;  %1395 = vmatprep.subr.bf16.mxu1 %v1519_v1  ;;  %v1488_v43 = vld [vmem:[%s1620_s28 + $0xe0] ss:$8 sps:$4 sm:$0xff]   ;;  %v1491_v45 = vld [vmem:[%s1620_s28 + $0xf4] ss:$8 sps:$4 sm:$0xff]   ;;  %v1493_v46 = vld [vmem:[%s1620_s28 + $0x70] ss:$8 sps:$4 sm:$0xff]  }
  0x20   : > { %v1494_v47 = vld [vmem:[%s1620_s28 + $0xf0] ss:$8 sps:$4 sm:$0xff]   ;;  %v305_v48 = vld [vmem:[#allocation2] sm:$0xff]  ;;  %v306_v56 = vld [vmem:[#allocation2 + $0x8] sm:$0xff] }
  0x21   : > { %v321_v49 = vld [vmem:[#allocation2 + $0x80] sm:$0xff]  ;;  %v322_v57 = vld [vmem:[#allocation2 + $0x88] sm:$0xff]  ;;  %v307_v0 = vld [vmem:[#allocation2 + $0x10] sm:$0xff] }
  0x22   : > { %656 = vmatpush1.bf16.msra.mxu0 %v1442_v9  ;;  %1405 = vmatpush1.bf16.msra.mxu1 %v1442_v9  ;;  %v1707_v2 = vld [vmem:[%s1850_s2] ss:$0 sm:$0xff]  ;;  %v308_v7 = vld [vmem:[#allocation2 + $0x18] sm:$0xff] }
  0x23   : > { %657 = vmatprep.subr.bf16.mxu0 %v1519_v1  ;;  %1396 = vmatprep.subr.bf16.mxu1 %v1519_v1  ;;  %v324_v12 = vld [vmem:[#allocation2 + $0x98] sm:$0xff] }
  0x26   : > { %658 = vmatpush1.bf16.msra.mxu0 %v1443_v10  ;;  %1406 = vmatpush1.bf16.msra.mxu1 %v1443_v10 }
  0x27   : > { %659 = vmatprep.subr.bf16.mxu0 %v1519_v1  ;;  %1397 = vmatprep.subr.bf16.mxu1 %v1519_v1 }
  0x2a   : > { %660 = vmatpush1.bf16.msra.mxu0 %v1444_v13  ;;  %1407 = vmatpush1.bf16.msra.mxu1 %v1444_v13 }
  0x2b   : > { %673 = vmatprep.subr.bf16.mxu0 %v1519_v1  ;;  %1398 = vmatprep.subr.bf16.mxu1 %v1519_v1 }
  0x2e   : > { %674 = vmatpush2.bf16.msra.mxu0 %v643_v16  ;;  %1408 = vmatpush2.bf16.msra.mxu1 %v643_v16 }
  0x2f   : > { %675 = vmatprep.subr.bf16.mxu0 %v1519_v1  ;;  %1399 = vmatprep.subr.bf16.mxu1 %v1519_v1  ;;  %v323_v1 = vld [vmem:[#allocation2 + $0x90] sm:$0xff] }
  0x32   : > { %676 = vmatpush2.bf16.msra.mxu0 %v1446_v17  ;;  %1409 = vmatpush2.bf16.msra.mxu1 %v1446_v17 }
  0x35   : > { %678 = vmatmul.mubr.bf16.vlgmr.msra.gmra.mxu0 %v1447_v18  ;;  %742 = vmatmul.mubr.bf16.vlgmr.msra.gmra.mxu1 %v1450_v19 }
  0x36   : > { %1307 = vmatprep.mubr.msk.bf16.mxu0 %vm589_vm1, %v1453_v20  ;;  %1315 = vmatprep.mubr.msk.bf16.mxu1 %vm589_vm1, %v1455_v21  ;;  %v309_v21 = vld [vmem:[#allocation2 + $0x20] sm:$0xff] }
  0x3d   : > { %686 = vmatmul.mubr.bf16.gmra.mxu0 %v1457_v22  ;;  %750 = vmatmul.mubr.bf16.gmra.mxu1 %v1458_v23 }
  0x3e   : > { %1308 = vmatprep.mubr.msk.bf16.mxu0 %vm589_vm1, %v1459_v24  ;;  %1316 = vmatprep.mubr.msk.bf16.mxu1 %vm589_vm1, %v1461_v25 }
  0x45   : > { %694 = vmatmul.mubr.bf16.gmra.mxu0 %v1463_v26  ;;  %758 = vmatmul.mubr.bf16.gmra.mxu1 %v1464_v27  ;;  %v325_v26 = vld [vmem:[#allocation2 + $0xa0] sm:$0xff] }
  0x46   : > { %1309 = vmatprep.mubr.msk.bf16.mxu0 %vm589_vm1, %v1465_v28  ;;  %1317 = vmatprep.mubr.msk.bf16.mxu1 %vm589_vm1, %v1467_v29 }
  0x4d   : > { %702 = vmatmul.mubr.bf16.gmra.mxu0 %v1469_v30  ;;  %766 = vmatmul.mubr.bf16.gmra.mxu1 %v1470_v31 }
  0x4e   : > { %1310 = vmatprep.mubr.msk.bf16.mxu0 %vm589_vm1, %v1471_v32  ;;  %1318 = vmatprep.mubr.msk.bf16.mxu1 %vm589_vm1, %v1473_v33 }
  0x55   : > { %710 = vmatmul.mubr.bf16.gmra.mxu0 %v1475_v34  ;;  %774 = vmatmul.mubr.bf16.gmra.mxu1 %v1476_v35 }
  0x56   : > { %1311 = vmatprep.mubr.msk.bf16.mxu0 %vm589_vm1, %v1477_v36  ;;  %1319 = vmatprep.mubr.msk.bf16.mxu1 %vm589_vm1, %v1479_v37  ;;  %v310_v37 = vld [vmem:[#allocation2 + $0x28] sm:$0xff] }
  0x5d   : > { %718 = vmatmul.mubr.bf16.gmra.mxu0 %v1481_v38  ;;  %782 = vmatmul.mubr.bf16.gmra.mxu1 %v1482_v39 }
  0x5e   : > { %1312 = vmatprep.mubr.msk.bf16.mxu0 %vm589_vm1, %v1483_v40  ;;  %1320 = vmatprep.mubr.msk.bf16.mxu1 %vm589_vm1, %v1485_v41 }
  0x65   : > { %726 = vmatmul.mubr.bf16.gmra.mxu0 %v1487_v42  ;;  %790 = vmatmul.mubr.bf16.gmra.mxu1 %v1488_v43  ;;  %v326_v42 = vld [vmem:[#allocation2 + $0xa8] sm:$0xff] }
  0x66   : > { %1313 = vmatprep.mubr.msk.bf16.mxu0 %vm589_vm1, %v1489_v44  ;;  %1321 = vmatprep.mubr.msk.bf16.mxu1 %vm589_vm1, %v1491_v45 }
  0x6d   : > { %734 = vmatmul.mubr.bf16.gmra.mxu0 %v1493_v46  ;;  %798 = vmatmul.mubr.bf16.gmra.mxu1 %v1494_v47 }
  0xf5   : > { %v679_v50 = vpop.f32.mrf.mxu0  ;;  %v743_v51 = vpop.f32.mrf.mxu1 }
  0xf6   : > { %v806_v52 = vadd.f32 %v679_v50, %v305_v48  ;;  %v822_v53 = vadd.f32 %v743_v51, %v321_v49 }
  0xf7   : > { %v681_v54 = vpop.f32.mrf.mxu0  ;;  %v745_v55 = vpop.f32.mrf.mxu1 }
  0xf8   : > { %839 = vst.msk [vmem:[#allocation2] sm:$0xff] %vm272_vm0, %v806_v52  ;;  %855 = vst.msk [vmem:[#allocation2 + $0x80] sm:$0xff] %vm272_vm0, %v822_v53  ;;  %v311_v53 = vld [vmem:[#allocation2 + $0x30] sm:$0xff] }
  0xf9   : > { %v682_v58 = vpop.f32.mrf.mxu0  ;;  %v746_v59 = vpop.f32.mrf.mxu1 }
  0xfa   : > { %v807_v60 = vadd.f32 %v682_v58, %v306_v56  ;;  %v823_v61 = vadd.f32 %v746_v59, %v322_v57  ;;  %v327_v58 = vld [vmem:[#allocation2 + $0xb0] sm:$0xff] }
  0xfb   : > { %v684_v62 = vpop.f32.mrf.mxu0  ;;  %v748_v63 = vpop.f32.mrf.mxu1 }
  0xfc   : > { %840 = vst.msk [vmem:[#allocation2 + $0x8] sm:$0xff] %vm272_vm0, %v807_v60  ;;  %856 = vst.msk [vmem:[#allocation2 + $0x88] sm:$0xff] %vm272_vm0, %v823_v61 }
  0xfd   : > { %v687_v3 = vpop.f32.mrf.mxu0  ;;  %v751_v4 = vpop.f32.mrf.mxu1 }
  0xfe   : > { %v808_v5 = vadd.f32 %v687_v3, %v307_v0  ;;  %v824_v6 = vadd.f32 %v751_v4, %v323_v1 }
  0xff   : > { %v874_v8 = vld [vmem:[#allocation2] sm:$0xff]  ;;  %v689_v10 = vpop.f32.mrf.mxu0  ;;  %v753_v11 = vpop.f32.mrf.mxu1 }
 0x100   : > { %v890_v9 = vld [vmem:[#allocation2 + $0x80] sm:$0xff]  ;;  %v913_v13 = vadd.f32 %v1707_v2, %v874_v8  ;;  %841 = vst.msk [vmem:[#allocation2 + $0x10] sm:$0xff] %vm272_vm0, %v808_v5  ;;  %857 = vst.msk [vmem:[#allocation2 + $0x90] sm:$0xff] %vm272_vm0, %v824_v6  ;;  %v312_v6 = vld [vmem:[#allocation2 + $0x38] sm:$0xff] }
 0x101   : > { %v929_v14 = vadd.f32 %v1707_v2, %v890_v9  ;;  %v690_v15 = vpop.f32.mrf.mxu0  ;;  %v754_v16 = vpop.f32.mrf.mxu1  ;;  %v328_v11 = vld [vmem:[#allocation2 + $0xb8] sm:$0xff] }
 0x102   : > { %v945_v17 = vmax.f32 %v913_v13, 0.0  ;;  %v809_v19 = vadd.f32 %v690_v15, %v308_v7  ;;  %v825_v20 = vadd.f32 %v754_v16, %v324_v12 }
 0x103   : > { %v961_v18 = vmax.f32 %v929_v14, 0.0  ;;  %v875_v22 = vld [vmem:[#allocation2 + $0x8] sm:$0xff]  ;;  %v692_v24 = vpop.f32.mrf.mxu0  ;;  %v756_v25 = vpop.f32.mrf.mxu1 }
 0x104   : > { %v891_v23 = vld [vmem:[#allocation2 + $0x88] sm:$0xff]  ;;  %v1358_v27 = vpack.c.bf16 %v945_v17, %v945_v17  ;;  %v914_v29 = vadd.f32 %v1707_v2, %v875_v22  ;;  %842 = vst.msk [vmem:[#allocation2 + $0x18] sm:$0xff] %vm272_vm0, %v809_v19  ;;  %858 = vst.msk [vmem:[#allocation2 + $0x98] sm:$0xff] %vm272_vm0, %v825_v20  ;;  %v313_v22 = vld [vmem:[#allocation2 + $0x40] sm:$0xff] }
 0x105   : > { %v1374_v28 = vpack.c.bf16 %v961_v18, %v961_v18  ;;  %v930_v30 = vadd.f32 %v1707_v2, %v891_v23  ;;  %v695_v31 = vpop.f32.mrf.mxu0  ;;  %v759_v32 = vpop.f32.mrf.mxu1 }
 0x106   : > { %1106 = vst.msk [vmem:[%s1717_s23] sm:$0xf] %vm1105_vm4, %v1358_v27  ;;  %v946_v33 = vmax.f32 %v914_v29, 0.0  ;;  %v810_v35 = vadd.f32 %v695_v31, %v309_v21  ;;  %v826_v36 = vadd.f32 %v759_v32, %v325_v26  ;;  %v329_v27 = vld [vmem:[#allocation2 + $0xc0] sm:$0xff] }
 0x107   : > { %1122 = vst.msk [vmem:[%s1717_s23 + $0x40] sm:$0xf] %vm1105_vm4, %v1374_v28  ;;  %v962_v34 = vmax.f32 %v930_v30, 0.0  ;;  %v876_v38 = vld [vmem:[#allocation2 + $0x10] sm:$0xff]  ;;  %v697_v40 = vpop.f32.mrf.mxu0  ;;  %v761_v41 = vpop.f32.mrf.mxu1 }
 0x108   : > { %v892_v39 = vld [vmem:[#allocation2 + $0x90] sm:$0xff]  ;;  %v1359_v43 = vpack.c.bf16 %v946_v33, %v946_v33  ;;  %v915_v45 = vadd.f32 %v1707_v2, %v876_v38  ;;  %843 = vst.msk [vmem:[#allocation2 + $0x20] sm:$0xff] %vm272_vm0, %v810_v35  ;;  %859 = vst.msk [vmem:[#allocation2 + $0xa0] sm:$0xff] %vm272_vm0, %v826_v36  ;;  %v314_v38 = vld [vmem:[#allocation2 + $0x48] sm:$0xff] }
 0x109   : > { %v1375_v44 = vpack.c.bf16 %v962_v34, %v962_v34  ;;  %v931_v46 = vadd.f32 %v1707_v2, %v892_v39  ;;  %v698_v47 = vpop.f32.mrf.mxu0  ;;  %v762_v48 = vpop.f32.mrf.mxu1 }
 0x10a   : > { %1107 = vst.msk [vmem:[%s1717_s23 + $0x4] sm:$0xf] %vm1105_vm4, %v1359_v43  ;;  %v947_v49 = vmax.f32 %v915_v45, 0.0  ;;  %v811_v51 = vadd.f32 %v698_v47, %v310_v37  ;;  %v827_v52 = vadd.f32 %v762_v48, %v326_v42  ;;  %v330_v43 = vld [vmem:[#allocation2 + $0xc8] sm:$0xff] }
 0x10b   : > { %1123 = vst.msk [vmem:[%s1717_s23 + $0x44] sm:$0xf] %vm1105_vm4, %v1375_v44  ;;  %v963_v50 = vmax.f32 %v931_v46, 0.0  ;;  %v877_v54 = vld [vmem:[#allocation2 + $0x18] sm:$0xff]  ;;  %v700_v56 = vpop.f32.mrf.mxu0  ;;  %v764_v57 = vpop.f32.mrf.mxu1 }
 0x10c   : > { %v893_v55 = vld [vmem:[#allocation2 + $0x98] sm:$0xff]  ;;  %v1360_v59 = vpack.c.bf16 %v947_v49, %v947_v49  ;;  %v916_v61 = vadd.f32 %v1707_v2, %v877_v54  ;;  %844 = vst.msk [vmem:[#allocation2 + $0x28] sm:$0xff] %vm272_vm0, %v811_v51  ;;  %860 = vst.msk [vmem:[#allocation2 + $0xa8] sm:$0xff] %vm272_vm0, %v827_v52  ;;  %v315_v54 = vld [vmem:[#allocation2 + $0x50] sm:$0xff] }
 0x10d   : > { %v1376_v60 = vpack.c.bf16 %v963_v50, %v963_v50  ;;  %v932_v62 = vadd.f32 %v1707_v2, %v893_v55  ;;  %v703_v63 = vpop.f32.mrf.mxu0  ;;  %v767_v0 = vpop.f32.mrf.mxu1 }
 0x10e   : > { %1108 = vst.msk [vmem:[%s1717_s23 + $0x8] sm:$0xf] %vm1105_vm4, %v1360_v59  ;;  %v948_v1 = vmax.f32 %v916_v61, 0.0  ;;  %v812_v4 = vadd.f32 %v703_v63, %v311_v53  ;;  %v828_v5 = vadd.f32 %v767_v0, %v327_v58  ;;  %v331_v59 = vld [vmem:[#allocation2 + $0xd0] sm:$0xff] }
 0x10f   : > { %1124 = vst.msk [vmem:[%s1717_s23 + $0x48] sm:$0xf] %vm1105_vm4, %v1376_v60  ;;  %v964_v3 = vmax.f32 %v932_v62, 0.0  ;;  %v878_v7 = vld [vmem:[#allocation2 + $0x20] sm:$0xff]  ;;  %v705_v9 = vpop.f32.mrf.mxu0  ;;  %v769_v10 = vpop.f32.mrf.mxu1 }
 0x110   : > { %v894_v8 = vld [vmem:[#allocation2 + $0xa0] sm:$0xff]  ;;  %v1361_v12 = vpack.c.bf16 %v948_v1, %v948_v1  ;;  %v917_v14 = vadd.f32 %v1707_v2, %v878_v7  ;;  %845 = vst.msk [vmem:[#allocation2 + $0x30] sm:$0xff] %vm272_vm0, %v812_v4  ;;  %861 = vst.msk [vmem:[#allocation2 + $0xb0] sm:$0xff] %vm272_vm0, %v828_v5  ;;  %v316_v7 = vld [vmem:[#allocation2 + $0x58] sm:$0xff] }
 0x111   : > { %v1377_v13 = vpack.c.bf16 %v964_v3, %v964_v3  ;;  %v933_v15 = vadd.f32 %v1707_v2, %v894_v8  ;;  %v706_v16 = vpop.f32.mrf.mxu0  ;;  %v770_v17 = vpop.f32.mrf.mxu1 }
 0x112   : > { %1109 = vst.msk [vmem:[%s1717_s23 + $0xc] sm:$0xf] %vm1105_vm4, %v1361_v12  ;;  %v949_v18 = vmax.f32 %v917_v14, 0.0  ;;  %v813_v20 = vadd.f32 %v706_v16, %v312_v6  ;;  %v829_v21 = vadd.f32 %v770_v17, %v328_v11  ;;  %v332_v12 = vld [vmem:[#allocation2 + $0xd8] sm:$0xff] }
 0x113   : > { %1125 = vst.msk [vmem:[%s1717_s23 + $0x4c] sm:$0xf] %vm1105_vm4, %v1377_v13  ;;  %v965_v19 = vmax.f32 %v933_v15, 0.0  ;;  %v879_v23 = vld [vmem:[#allocation2 + $0x28] sm:$0xff]  ;;  %v708_v25 = vpop.f32.mrf.mxu0  ;;  %v772_v26 = vpop.f32.mrf.mxu1 }
 0x114   : > { %v895_v24 = vld [vmem:[#allocation2 + $0xa8] sm:$0xff]  ;;  %v1362_v28 = vpack.c.bf16 %v949_v18, %v949_v18  ;;  %v918_v30 = vadd.f32 %v1707_v2, %v879_v23  ;;  %846 = vst.msk [vmem:[#allocation2 + $0x38] sm:$0xff] %vm272_vm0, %v813_v20  ;;  %862 = vst.msk [vmem:[#allocation2 + $0xb8] sm:$0xff] %vm272_vm0, %v829_v21  ;;  %v317_v23 = vld [vmem:[#allocation2 + $0x60] sm:$0xff] }
 0x115   : > { %v1378_v29 = vpack.c.bf16 %v965_v19, %v965_v19  ;;  %v934_v31 = vadd.f32 %v1707_v2, %v895_v24  ;;  %v711_v32 = vpop.f32.mrf.mxu0  ;;  %v775_v33 = vpop.f32.mrf.mxu1 }
 0x116   : > { %1110 = vst.msk [vmem:[%s1717_s23 + $0x10] sm:$0xf] %vm1105_vm4, %v1362_v28  ;;  %v950_v34 = vmax.f32 %v918_v30, 0.0  ;;  %v814_v36 = vadd.f32 %v711_v32, %v313_v22  ;;  %v830_v37 = vadd.f32 %v775_v33, %v329_v27  ;;  %v333_v28 = vld [vmem:[#allocation2 + $0xe0] sm:$0xff] }
 0x117   : > { %1126 = vst.msk [vmem:[%s1717_s23 + $0x50] sm:$0xf] %vm1105_vm4, %v1378_v29  ;;  %v966_v35 = vmax.f32 %v934_v31, 0.0  ;;  %v880_v39 = vld [vmem:[#allocation2 + $0x30] sm:$0xff]  ;;  %v713_v41 = vpop.f32.mrf.mxu0  ;;  %v777_v42 = vpop.f32.mrf.mxu1 }
 0x118   : > { %v896_v40 = vld [vmem:[#allocation2 + $0xb0] sm:$0xff]  ;;  %v1363_v44 = vpack.c.bf16 %v950_v34, %v950_v34  ;;  %v919_v46 = vadd.f32 %v1707_v2, %v880_v39  ;;  %847 = vst.msk [vmem:[#allocation2 + $0x40] sm:$0xff] %vm272_vm0, %v814_v36  ;;  %863 = vst.msk [vmem:[#allocation2 + $0xc0] sm:$0xff] %vm272_vm0, %v830_v37  ;;  %v318_v39 = vld [vmem:[#allocation2 + $0x68] sm:$0xff] }
 0x119   : > { %v1379_v45 = vpack.c.bf16 %v966_v35, %v966_v35  ;;  %v935_v47 = vadd.f32 %v1707_v2, %v896_v40  ;;  %v714_v48 = vpop.f32.mrf.mxu0  ;;  %v778_v49 = vpop.f32.mrf.mxu1 }
 0x11a   : > { %1111 = vst.msk [vmem:[%s1717_s23 + $0x14] sm:$0xf] %vm1105_vm4, %v1363_v44  ;;  %v951_v50 = vmax.f32 %v919_v46, 0.0  ;;  %v815_v52 = vadd.f32 %v714_v48, %v314_v38  ;;  %v831_v53 = vadd.f32 %v778_v49, %v330_v43  ;;  %v334_v44 = vld [vmem:[#allocation2 + $0xe8] sm:$0xff] }
 0x11b   : > { %1127 = vst.msk [vmem:[%s1717_s23 + $0x54] sm:$0xf] %vm1105_vm4, %v1379_v45  ;;  %v967_v51 = vmax.f32 %v935_v47, 0.0  ;;  %v881_v55 = vld [vmem:[#allocation2 + $0x38] sm:$0xff]  ;;  %v716_v57 = vpop.f32.mrf.mxu0  ;;  %v780_v58 = vpop.f32.mrf.mxu1 }
 0x11c   : > { %v897_v56 = vld [vmem:[#allocation2 + $0xb8] sm:$0xff]  ;;  %v1364_v60 = vpack.c.bf16 %v951_v50, %v951_v50  ;;  %v920_v62 = vadd.f32 %v1707_v2, %v881_v55  ;;  %848 = vst.msk [vmem:[#allocation2 + $0x48] sm:$0xff] %vm272_vm0, %v815_v52  ;;  %864 = vst.msk [vmem:[#allocation2 + $0xc8] sm:$0xff] %vm272_vm0, %v831_v53  ;;  %v319_v55 = vld [vmem:[#allocation2 + $0x70] sm:$0xff] }
 0x11d   : > { %v1380_v61 = vpack.c.bf16 %v967_v51, %v967_v51  ;;  %v936_v63 = vadd.f32 %v1707_v2, %v897_v56  ;;  %v719_v0 = vpop.f32.mrf.mxu0  ;;  %v783_v1 = vpop.f32.mrf.mxu1 }
 0x11e   : > { %1112 = vst.msk [vmem:[%s1717_s23 + $0x18] sm:$0xf] %vm1105_vm4, %v1364_v60  ;;  %v952_v3 = vmax.f32 %v920_v62, 0.0  ;;  %v816_v5 = vadd.f32 %v719_v0, %v315_v54  ;;  %v832_v6 = vadd.f32 %v783_v1, %v331_v59  ;;  %v335_v60 = vld [vmem:[#allocation2 + $0xf0] sm:$0xff] }
 0x11f   : > { %1128 = vst.msk [vmem:[%s1717_s23 + $0x58] sm:$0xf] %vm1105_vm4, %v1380_v61  ;;  %v968_v4 = vmax.f32 %v936_v63, 0.0  ;;  %v882_v8 = vld [vmem:[#allocation2 + $0x40] sm:$0xff]  ;;  %v721_v10 = vpop.f32.mrf.mxu0  ;;  %v785_v11 = vpop.f32.mrf.mxu1 }
 0x120   : > { %v898_v9 = vld [vmem:[#allocation2 + $0xc0] sm:$0xff]  ;;  %v1365_v13 = vpack.c.bf16 %v952_v3, %v952_v3  ;;  %v921_v15 = vadd.f32 %v1707_v2, %v882_v8  ;;  %849 = vst.msk [vmem:[#allocation2 + $0x50] sm:$0xff] %vm272_vm0, %v816_v5  ;;  %865 = vst.msk [vmem:[#allocation2 + $0xd0] sm:$0xff] %vm272_vm0, %v832_v6  ;;  %v320_v8 = vld [vmem:[#allocation2 + $0x78] sm:$0xff] }
 0x121   : > { %v1381_v14 = vpack.c.bf16 %v968_v4, %v968_v4  ;;  %v937_v16 = vadd.f32 %v1707_v2, %v898_v9  ;;  %v722_v17 = vpop.f32.mrf.mxu0  ;;  %v786_v18 = vpop.f32.mrf.mxu1 }
 0x122   : > { %1113 = vst.msk [vmem:[%s1717_s23 + $0x1c] sm:$0xf] %vm1105_vm4, %v1365_v13  ;;  %v953_v19 = vmax.f32 %v921_v15, 0.0  ;;  %v817_v21 = vadd.f32 %v722_v17, %v316_v7  ;;  %v833_v22 = vadd.f32 %v786_v18, %v332_v12  ;;  %v336_v13 = vld [vmem:[#allocation2 + $0xf8] sm:$0xff] }
 0x123   : > { %1129 = vst.msk [vmem:[%s1717_s23 + $0x5c] sm:$0xf] %vm1105_vm4, %v1381_v14  ;;  %v969_v20 = vmax.f32 %v937_v16, 0.0  ;;  %v883_v24 = vld [vmem:[#allocation2 + $0x48] sm:$0xff]  ;;  %v724_v26 = vpop.f32.mrf.mxu0  ;;  %v788_v27 = vpop.f32.mrf.mxu1 }
 0x124   : > { %v899_v25 = vld [vmem:[#allocation2 + $0xc8] sm:$0xff]  ;;  %v1366_v29 = vpack.c.bf16 %v953_v19, %v953_v19  ;;  %v922_v31 = vadd.f32 %v1707_v2, %v883_v24  ;;  %850 = vst.msk [vmem:[#allocation2 + $0x58] sm:$0xff] %vm272_vm0, %v817_v21  ;;  %866 = vst.msk [vmem:[#allocation2 + $0xd8] sm:$0xff] %vm272_vm0, %v833_v22 }
 0x125   : > { %v1382_v30 = vpack.c.bf16 %v969_v20, %v969_v20  ;;  %v938_v32 = vadd.f32 %v1707_v2, %v899_v25  ;;  %v727_v33 = vpop.f32.mrf.mxu0  ;;  %v791_v34 = vpop.f32.mrf.mxu1 }
 0x126   : > { %1114 = vst.msk [vmem:[%s1717_s23 + $0x20] sm:$0xf] %vm1105_vm4, %v1366_v29  ;;  %v954_v35 = vmax.f32 %v922_v31, 0.0  ;;  %v818_v37 = vadd.f32 %v727_v33, %v317_v23  ;;  %v834_v38 = vadd.f32 %v791_v34, %v333_v28 }
 0x127   : > { %1130 = vst.msk [vmem:[%s1717_s23 + $0x60] sm:$0xf] %vm1105_vm4, %v1382_v30  ;;  %v970_v36 = vmax.f32 %v938_v32, 0.0  ;;  %v884_v40 = vld [vmem:[#allocation2 + $0x50] sm:$0xff]  ;;  %v729_v42 = vpop.f32.mrf.mxu0  ;;  %v793_v43 = vpop.f32.mrf.mxu1 }
 0x128   : > { %v900_v41 = vld [vmem:[#allocation2 + $0xd0] sm:$0xff]  ;;  %v1367_v45 = vpack.c.bf16 %v954_v35, %v954_v35  ;;  %v923_v47 = vadd.f32 %v1707_v2, %v884_v40  ;;  %851 = vst.msk [vmem:[#allocation2 + $0x60] sm:$0xff] %vm272_vm0, %v818_v37  ;;  %867 = vst.msk [vmem:[#allocation2 + $0xe0] sm:$0xff] %vm272_vm0, %v834_v38 }
 0x129   : > { %v1383_v46 = vpack.c.bf16 %v970_v36, %v970_v36  ;;  %v939_v48 = vadd.f32 %v1707_v2, %v900_v41  ;;  %v730_v49 = vpop.f32.mrf.mxu0  ;;  %v794_v50 = vpop.f32.mrf.mxu1 }
 0x12a   : > { %1115 = vst.msk [vmem:[%s1717_s23 + $0x24] sm:$0xf] %vm1105_vm4, %v1367_v45  ;;  %v955_v51 = vmax.f32 %v923_v47, 0.0  ;;  %v819_v53 = vadd.f32 %v730_v49, %v318_v39  ;;  %v835_v54 = vadd.f32 %v794_v50, %v334_v44 }
 0x12b   : > { %1131 = vst.msk [vmem:[%s1717_s23 + $0x64] sm:$0xf] %vm1105_vm4, %v1383_v46  ;;  %v971_v52 = vmax.f32 %v939_v48, 0.0  ;;  %v885_v56 = vld [vmem:[#allocation2 + $0x58] sm:$0xff]  ;;  %v732_v58 = vpop.f32.mrf.mxu0  ;;  %v796_v59 = vpop.f32.mrf.mxu1 }
 0x12c   : > { %v901_v57 = vld [vmem:[#allocation2 + $0xd8] sm:$0xff]  ;;  %v1368_v61 = vpack.c.bf16 %v955_v51, %v955_v51  ;;  %v924_v63 = vadd.f32 %v1707_v2, %v885_v56  ;;  %852 = vst.msk [vmem:[#allocation2 + $0x68] sm:$0xff] %vm272_vm0, %v819_v53  ;;  %868 = vst.msk [vmem:[#allocation2 + $0xe8] sm:$0xff] %vm272_vm0, %v835_v54 }
 0x12d   : > { %v1384_v62 = vpack.c.bf16 %v971_v52, %v971_v52  ;;  %v940_v0 = vadd.f32 %v1707_v2, %v901_v57  ;;  %v735_v1 = vpop.f32.mrf.mxu0  ;;  %v799_v3 = vpop.f32.mrf.mxu1 }
 0x12e   : > { %1116 = vst.msk [vmem:[%s1717_s23 + $0x28] sm:$0xf] %vm1105_vm4, %v1368_v61  ;;  %v956_v4 = vmax.f32 %v924_v63, 0.0  ;;  %v820_v6 = vadd.f32 %v735_v1, %v319_v55  ;;  %v836_v7 = vadd.f32 %v799_v3, %v335_v60 }
 0x12f   : > { %1132 = vst.msk [vmem:[%s1717_s23 + $0x68] sm:$0xf] %vm1105_vm4, %v1384_v62  ;;  %v972_v5 = vmax.f32 %v940_v0, 0.0  ;;  %v886_v9 = vld [vmem:[#allocation2 + $0x60] sm:$0xff]  ;;  %v737_v11 = vpop.f32.mrf.mxu0  ;;  %v801_v12 = vpop.f32.mrf.mxu1 }
 0x130   : > { %v902_v10 = vld [vmem:[#allocation2 + $0xe0] sm:$0xff]  ;;  %v1369_v14 = vpack.c.bf16 %v956_v4, %v956_v4  ;;  %v925_v16 = vadd.f32 %v1707_v2, %v886_v9  ;;  %853 = vst.msk [vmem:[#allocation2 + $0x70] sm:$0xff] %vm272_vm0, %v820_v6  ;;  %869 = vst.msk [vmem:[#allocation2 + $0xf0] sm:$0xff] %vm272_vm0, %v836_v7 }
 0x131   : > { %v1385_v15 = vpack.c.bf16 %v972_v5, %v972_v5  ;;  %v941_v17 = vadd.f32 %v1707_v2, %v902_v10  ;;  %v738_v18 = vpop.f32.mrf.mxu0  ;;  %v802_v19 = vpop.f32.mrf.mxu1 }
 0x132   : > { %1117 = vst.msk [vmem:[%s1717_s23 + $0x2c] sm:$0xf] %vm1105_vm4, %v1369_v14  ;;  %v957_v20 = vmax.f32 %v925_v16, 0.0  ;;  %v821_v22 = vadd.f32 %v738_v18, %v320_v8  ;;  %v837_v23 = vadd.f32 %v802_v19, %v336_v13 }
 0x133   : > { %1133 = vst.msk [vmem:[%s1717_s23 + $0x6c] sm:$0xf] %vm1105_vm4, %v1385_v15  ;;  %v973_v21 = vmax.f32 %v941_v17, 0.0  ;;  %v887_v24 = vld [vmem:[#allocation2 + $0x68] sm:$0xff]  ;;  %v740_v26 = vpop.f32.mrf.mxu0  ;;  %v804_v27 = vpop.f32.mrf.mxu1 }
 0x134   : > { %v903_v25 = vld [vmem:[#allocation2 + $0xe8] sm:$0xff]  ;;  %v1370_v28 = vpack.c.bf16 %v957_v20, %v957_v20  ;;  %v926_v30 = vadd.f32 %v1707_v2, %v887_v24  ;;  %854 = vst.msk [vmem:[#allocation2 + $0x78] sm:$0xff] %vm272_vm0, %v821_v22  ;;  %870 = vst.msk [vmem:[#allocation2 + $0xf8] sm:$0xff] %vm272_vm0, %v837_v23 }
 0x135   : > { %v1386_v29 = vpack.c.bf16 %v973_v21, %v973_v21  ;;  %v942_v31 = vadd.f32 %v1707_v2, %v903_v25 }
 0x136   : > { %1118 = vst.msk [vmem:[%s1717_s23 + $0x30] sm:$0xf] %vm1105_vm4, %v1370_v28  ;;  %v958_v32 = vmax.f32 %v926_v30, 0.0 }
 0x137   : > { %1134 = vst.msk [vmem:[%s1717_s23 + $0x70] sm:$0xf] %vm1105_vm4, %v1386_v29  ;;  %v974_v33 = vmax.f32 %v942_v31, 0.0  ;;  %v888_v34 = vld [vmem:[#allocation2 + $0x70] sm:$0xff] }
 0x138   : > { %v904_v35 = vld [vmem:[#allocation2 + $0xf0] sm:$0xff]  ;;  %v1371_v36 = vpack.c.bf16 %v958_v32, %v958_v32  ;;  %v927_v38 = vadd.f32 %v1707_v2, %v888_v34 }
 0x139   : > { %v1387_v37 = vpack.c.bf16 %v974_v33, %v974_v33  ;;  %v943_v39 = vadd.f32 %v1707_v2, %v904_v35 }
 0x13a   : > { %1119 = vst.msk [vmem:[%s1717_s23 + $0x34] sm:$0xf] %vm1105_vm4, %v1371_v36  ;;  %v959_v40 = vmax.f32 %v927_v38, 0.0 }
 0x13b   : > { %1135 = vst.msk [vmem:[%s1717_s23 + $0x74] sm:$0xf] %vm1105_vm4, %v1387_v37  ;;  %v975_v41 = vmax.f32 %v943_v39, 0.0  ;;  %v889_v42 = vld [vmem:[#allocation2 + $0x78] sm:$0xff] }
 0x13c   : > { %v905_v43 = vld [vmem:[#allocation2 + $0xf8] sm:$0xff]  ;;  %v1372_v44 = vpack.c.bf16 %v959_v40, %v959_v40  ;;  %v928_v46 = vadd.f32 %v1707_v2, %v889_v42 }
 0x13d   : > { %v1388_v45 = vpack.c.bf16 %v975_v41, %v975_v41  ;;  %v944_v47 = vadd.f32 %v1707_v2, %v905_v43 }
 0x13e   : > { %1120 = vst.msk [vmem:[%s1717_s23 + $0x38] sm:$0xf] %vm1105_vm4, %v1372_v44  ;;  %v960_v48 = vmax.f32 %v928_v46, 0.0 }
 0x13f   : > { %1136 = vst.msk [vmem:[%s1717_s23 + $0x78] sm:$0xf] %vm1105_vm4, %v1388_v45  ;;  %v976_v49 = vmax.f32 %v944_v47, 0.0 }
 0x140   : > { %v1373_v50 = vpack.c.bf16 %v960_v48, %v960_v48 }
 0x141   : > { %v1389_v51 = vpack.c.bf16 %v976_v49, %v976_v49 }
 0x142   : > { %1121 = vst.msk [vmem:[%s1717_s23 + $0x3c] sm:$0xf] %vm1105_vm4, %v1373_v50 }
 0x143   : > { %1137 = vst.msk [vmem:[%s1717_s23 + $0x7c] sm:$0xf] %vm1105_vm4, %v1389_v51 }
 0x144 PF: > { %s13_s14 = sadd.s32 1, %s1517_s14   ;;  %s1852_s12 = smov %s1513_s13 }
 0x145   : > { %p10_p5 = scmp.ge.s32.totalorder %s13_s14, 10   ;;  %s1853_s13 = smov %s1855_s15 }
 0x147   :  { %12 = sbr.rel (!%p10_p5) target bundleno = 2 (0x2), region = 76 }

</bundles_post_ra>
